<compile_context>
chip_gen: v7x
topology: tpu7x:2x2x1
jax: 0.10.0
libtpu: 0.0.40
codegen_flags: <defaults>
</compile_context>

<pallas_src>
import functools
import math

import jax
import jax.numpy as jnp
from jax.experimental import pallas as pl
from jax.experimental.pallas import tpu as pltpu

# ArcFace margin parameters (the `margin_loss` callable of the PyTorch module).
ARC_S = 64.0
ARC_M = 0.5
COS_M = math.cos(ARC_M)
SIN_M = math.sin(ARC_M)
NORM_EPS = 1e-12                      # F.normalize eps
_FALLBACK_VMEM = 64 * 1024 * 1024     # v7x per-TC capacity (most conservative)


def partial_fc_kernel(labels_ref, emb_ref, wt_ref, invw_ref,
                      orig_ref, mod_ref, rowloss_ref,
                      m_sc, l_sc, t_sc,
                      *, num_classes, padded_classes):
    j = pl.program_id(0)              # class tile (outer axis)
    i = pl.program_id(1)              # batch tile (inner axis)
    tc = wt_ref.shape[1]

    @pl.when(j == 0)
    def _init():
        m_sc[i] = jnp.full(m_sc.shape[1:], -jnp.inf, jnp.float32)
        l_sc[i] = jnp.zeros(l_sc.shape[1:], jnp.float32)
        t_sc[i] = jnp.zeros(t_sc.shape[1:], jnp.float32)

    # --- embedding L2-normalization (f32 math, rsqrt -> EUP slot). ---
    emb = emb_ref[...].astype(jnp.float32)
    inv_e = jax.lax.rsqrt(jnp.maximum(jnp.sum(emb * emb, axis=1, keepdims=True),
                                      NORM_EPS * NORM_EPS))
    emb_n = (emb * inv_e).astype(wt_ref.dtype)

    # --- MXU matmul against the pre-transposed (E, tc) weight tile;
    #     f32 accumulate, per-class rescale with the exact f32 inverse norm. ---
    raw = jnp.dot(emb_n, wt_ref[...], preferred_element_type=jnp.float32)
    logits = raw * invw_ref[...]                          # (1, tc) f32 broadcast
    orig_ref[...] = logits.astype(orig_ref.dtype)

    clamped = jnp.clip(logits, -1.0, 1.0)
    labels = labels_ref[...]                              # (tb, 1) int32
    col = jax.lax.broadcasted_iota(jnp.int32, clamped.shape, 1) + j * tc
    is_target = col == labels                             # -1 labels never match
    in_tile = jnp.logical_and(labels >= j * tc, labels < (j + 1) * tc)

    # ArcFace margin only on the (tb, 1) target cosine, not the full tile.
    tgt_cos = jnp.sum(jnp.where(is_target, clamped, 0.0), axis=1, keepdims=True)
    sine = jnp.sqrt(jnp.clip(1.0 - tgt_cos * tgt_cos, 0.0, 1.0))
    margin = tgt_cos * COS_M - sine * SIN_M               # cos(theta + m)
    # TODO(synk): insightface CombinedMarginLoss easy-margin / theta>pi-m
    # threshold variants are not reproduced; plain cos(theta+m) is used.
    mod = jnp.where(is_target, margin, clamped) * ARC_S
    mod_ref[...] = mod.astype(mod_ref.dtype)

    # --- online log-sum-exp across class tiles (f32 accumulators). ---
    if padded_classes > num_classes:
        mod_lse = jnp.where(col < num_classes, mod, -jnp.inf)  # mask padded cols
    else:
        mod_lse = mod
    # TODO(synk): on v6e/v7x the exp below could run in bf16 (2x EUP rate) once
    # the kernel stops being HBM-bound; kept f32 for v5e correctness.
    m_prev = m_sc[i]
    m_new = jnp.maximum(m_prev, jnp.max(mod_lse, axis=1, keepdims=True))
    l_new = (jnp.exp(m_prev - m_new) * l_sc[i]
             + jnp.sum(jnp.exp(mod_lse - m_new), axis=1, keepdims=True))
    t_new = t_sc[i] + jnp.where(in_tile, margin * ARC_S, 0.0)
    m_sc[i] = m_new
    l_sc[i] = l_new
    t_sc[i] = t_new

    # Running partial per-row loss; the final (last class tile) write wins.
    rowloss_ref[...] = m_new + jnp.log(l_new) - t_new


def _vmem_capacity_bytes():
    try:
        cap = getattr(pltpu.get_tpu_info(), "vmem_capacity_bytes", None)
        if cap:
            return int(cap)
    except Exception:
        pass
    return _FALLBACK_VMEM


def _pick_tc(C, E, tb, w_bytes, out_bytes, budget_bytes):
    """Largest class tile (multiple of 128, <= padded C) fitting the VMEM budget."""
    c_aligned = ((C + 127) // 128) * 128
    for tc in (2048, 1024, 512, 256, 128):
        if tc > c_aligned:
            continue
        need = (2 * tc * E * w_bytes             # double-buffered weight^T tile
                + 2 * tb * E * 4                 # double-buffered embedding block
                + 2 * 2 * tb * tc * out_bytes    # double-buffered orig/mod out tiles
                + 4 * tb * tc * 4)               # f32 elementwise temporaries headroom
        if need <= budget_bytes:
            return tc
    return 128


def partial_fc_forward(embeddings, labels, weight, *, tb=None, tc=None,
                       weight_dtype=jnp.bfloat16, out_dtype=jnp.bfloat16):
    """embeddings: [B, E] f32, labels: [B] int, weight: [C, E] f32.

    Returns (loss, modified_logits [B, C], original_logits [B, C]).
    weight_dtype/out_dtype default to bf16: the weight stream (~2/3 of HBM
    traffic) and the two [B, C] logit writes (~1/3) are the bandwidth
    bottleneck; this mirrors the module's fp16-autocast matmul path.  Pass
    jnp.float32 for the fp16=False full-precision math.
    """
    B, E = embeddings.shape
    C, E2 = weight.shape
    assert E == E2
    if tb is None:
        tb = B                       # keep nb == 1 unless the batch must be tiled
    assert B % tb == 0 and (tb == B or tb % 8 == 0), "tb must divide B (multiple of 8)"
    nb = B // tb

    w_bytes = jnp.dtype(weight_dtype).itemsize
    out_bytes = jnp.dtype(out_dtype).itemsize
    capacity = _vmem_capacity_bytes()
    budget = capacity // 2                  # tile-pick budget ~ 0.5 * VMEM capacity
    vmem_limit = (3 * capacity) // 4        # scoped VMEM limit ~ 0.75 * capacity

    if tc is None:
        tc = _pick_tc(C, E, tb, w_bytes, out_bytes, budget)
    assert tc % 128 == 0, "tc must be a multiple of 128"
    c_pad = ((C + tc - 1) // tc) * tc
    nc = c_pad // tc

    # Exact per-class inverse norms in f32, computed once in the wrapper.
    w_f32 = weight.astype(jnp.float32)
    inv_w = jax.lax.rsqrt(jnp.maximum(jnp.sum(w_f32 * w_f32, axis=1),
                                      NORM_EPS * NORM_EPS))
    inv_w = jnp.pad(inv_w, (0, c_pad - C), constant_values=1.0).reshape(1, c_pad)

    # Pre-transposed, padded, reduced-precision weight stream (E, c_pad):
    # canonical (tb,E)@(E,tc) MXU contraction (no per-tile transpose) and the
    # bf16 cast halves the dominant HBM stream.
    w_t = jnp.pad(weight, ((0, c_pad - C), (0, 0))).T.astype(weight_dtype)

    labels2d = labels.astype(jnp.int32).reshape(B, 1)

    kernel = functools.partial(partial_fc_kernel,
                               num_classes=C, padded_classes=c_pad)

    # Grid: class tiles outer, batch tiles inner -> the weight tile is DMA'd
    # exactly once overall.  Both axes "arbitrary": batch-parallel dual-TC
    # sharding would double the weight traffic in a mem-bound kernel.
    # TODO(synk): optional dual-TC class-sharding with per-core (m, l, t)
    # partials combined in the wrapper (v7x).
    orig, mod, rowloss = pl.pallas_call(
        kernel,
        out_shape=(jax.ShapeDtypeStruct((B, c_pad), out_dtype),
                   jax.ShapeDtypeStruct((B, c_pad), out_dtype),
                   jax.ShapeDtypeStruct((B, 1), jnp.float32)),
        grid_spec=pltpu.PrefetchScalarGridSpec(
            num_scalar_prefetch=0,
            grid=(nc, nb),
            in_specs=[pl.BlockSpec((tb, 1), lambda j, i: (i, 0)),    # labels
                      pl.BlockSpec((tb, E), lambda j, i: (i, 0)),    # embeddings
                      # TODO(synk): pipeline_mode=pl.Buffered(3) on this spec
                      # for v5e/v6e (128 MiB VMEM) to smooth DMA jitter; kept
                      # at default double-buffering for v7x's 64 MiB.
                      pl.BlockSpec((E, tc), lambda j, i: (0, j)),    # weight^T tile
                      pl.BlockSpec((1, tc), lambda j, i: (0, j))],   # 1/||w_c|| (f32)
            out_specs=[pl.BlockSpec((tb, tc), lambda j, i: (i, j)),  # original logits
                       pl.BlockSpec((tb, tc), lambda j, i: (i, j)),  # modified logits
                       pl.BlockSpec((tb, 1), lambda j, i: (i, 0))],  # per-row loss
            scratch_shapes=[pltpu.VMEM((nb, tb, 1), jnp.float32),    # running max
                            pltpu.VMEM((nb, tb, 1), jnp.float32),    # running sum
                            pltpu.VMEM((nb, tb, 1), jnp.float32)],   # target logit
        ),
        compiler_params=pltpu.CompilerParams(
            dimension_semantics=("arbitrary", "arbitrary"),
            vmem_limit_bytes=vmem_limit),
    )(labels2d, embeddings.astype(jnp.float32), w_t, inv_w)

    orig = orig[:, :C]
    mod = mod[:, :C]

    # Masked mean over valid rows (tiny wrapper op on B elements).
    valid = labels2d != -1
    n_valid = jnp.sum(valid.astype(jnp.float32))
    loss_sum = jnp.sum(jnp.where(valid, rowloss, 0.0))
    loss = jnp.where(n_valid > 0.0, loss_sum / jnp.maximum(n_valid, 1.0), 0.0)

    # TODO(synk): PyTorch returns modified_logits[valid_mask] (dynamic row
    # count); dynamic shapes aren't expressible here, full [B, C] is returned.
    return loss, mod, orig


def _reference(embeddings, labels, weight, weight_dtype=jnp.bfloat16):
    """Pure-JAX mirror of the kernel numerics (matmul inputs in `weight_dtype`,
    everything else f32).  With weight_dtype=float32 this is the fp16=False
    PyTorch forward."""
    emb = embeddings.astype(jnp.float32)
    inv_e = jax.lax.rsqrt(jnp.maximum(jnp.sum(emb * emb, axis=1, keepdims=True),
                                      NORM_EPS * NORM_EPS))
    emb_n = (emb * inv_e).astype(weight_dtype)
    w_f32 = weight.astype(jnp.float32)
    inv_w = jax.lax.rsqrt(jnp.maximum(jnp.sum(w_f32 * w_f32, axis=1),
                                      NORM_EPS * NORM_EPS))
    logits = jnp.dot(emb_n, weight.T.astype(weight_dtype),
                     preferred_element_type=jnp.float32) * inv_w[None, :]
    orig = logits
    clamped = jnp.clip(logits, -1.0, 1.0)
    col = jnp.arange(weight.shape[0])[None, :]
    is_target = col == labels[:, None]
    tgt_cos = jnp.sum(jnp.where(is_target, clamped, 0.0), axis=1, keepdims=True)
    sine = jnp.sqrt(jnp.clip(1.0 - tgt_cos * tgt_cos, 0.0, 1.0))
    margin = tgt_cos * COS_M - sine * SIN_M
    mod = jnp.where(is_target, margin, clamped) * ARC_S
    valid = labels != -1
    lse = jax.scipy.special.logsumexp(mod, axis=1)
    tgt = jnp.sum(jnp.where(is_target, mod, 0.0), axis=1)
    row_loss = lse - tgt
    loss = jnp.sum(jnp.where(valid, row_loss, 0.0)) / jnp.maximum(
        jnp.sum(valid.astype(jnp.float32)), 1.0)
    return loss, mod, orig


if __name__ == "__main__":
    root = jax.random.PRNGKey(0)

    def run_case(case_id, B, E, C, loose=False, **kw):
        k1, k2, k3 = jax.random.split(jax.random.fold_in(root, case_id), 3)
        emb = jax.random.normal(k1, (B, E), dtype=jnp.float32)
        # torch.normal(mean=0.0, std=0.01, size=(num_classes, embedding_size))
        w = 0.01 * jax.random.normal(k2, (C, E), dtype=jnp.float32)
        lbl = jax.random.randint(k3, (B,), 0, C, dtype=jnp.int32)
        lbl = lbl.at[3].set(-1)                      # exercise the valid-mask path
        wd = kw.get("weight_dtype", jnp.bfloat16)
        ref_loss, ref_mod, ref_orig = _reference(emb, lbl, w, weight_dtype=wd)

        loss, mod, orig = partial_fc_forward(emb, lbl, w, **kw)
        jax.block_until_ready((loss, mod, orig))
        assert orig.shape == (B, C) and mod.shape == (B, C)
        if loose:
            # f32 matmul path: XLA's default f32 dot precision on TPU may
            # differ from Mosaic's, so only a smoke-level comparison.
            o_tol, m_tol, l_tol = (dict(atol=2e-2, rtol=1e-2),
                                   dict(atol=0.5, rtol=1e-2),
                                   dict(atol=0.5, rtol=2e-2))
        else:
            # bf16-streamed path: kernel and reference use identical bf16
            # matmul inputs with f32 accumulate; only output-cast rounding.
            o_tol, m_tol, l_tol = (dict(atol=1e-2, rtol=1e-2),
                                   dict(atol=0.3, rtol=1e-2),
                                   dict(atol=5e-3, rtol=1e-3))
        assert jnp.allclose(orig.astype(jnp.float32), ref_orig, **o_tol), f"orig mismatch (case {case_id})"
        assert jnp.allclose(mod.astype(jnp.float32), ref_mod, **m_tol), f"mod mismatch (case {case_id})"
        assert jnp.allclose(loss, ref_loss, **l_tol), f"loss mismatch (case {case_id})"

    # 1) full-f32 path (fp16=False math), single class tile.
    run_case(1, B=8, E=128, C=256, loose=True,
             weight_dtype=jnp.float32, out_dtype=jnp.float32)
    # 2) default bf16-streamed path, auto tile pick.
    run_case(2, B=8, E=128, C=256)
    # 3) non-divisible class count -> padding + masked online LSE, 2 class tiles.
    run_case(3, B=8, E=128, C=200, tc=128)
    # 4) tiled batch (nb > 1): per-tile accumulators + weight DMA reuse across
    #    the inner batch axis.
    run_case(4, B=16, E=128, C=200, tb=8, tc=128)

    print("KERNEL_OK")
</pallas_src>

<mosaic_0001>
module attributes {stable_mosaic.version = 11 : i64} {
  func.func @partial_fc_kernel(%arg0: i32, %arg1: i32, %arg2: memref<8x1xi32, #tpu.memory_space<vmem>>, %arg3: memref<8x128xf32, #tpu.memory_space<vmem>>, %arg4: memref<128x256xf32, #tpu.memory_space<vmem>>, %arg5: memref<1x256xf32, #tpu.memory_space<vmem>>, %arg6: memref<8x256xf32, #tpu.memory_space<vmem>>, %arg7: memref<8x256xf32, #tpu.memory_space<vmem>>, %arg8: memref<8x1xf32, #tpu.memory_space<vmem>>, %arg9: memref<1x8x1xf32, #tpu.memory_space<vmem>>, %arg10: memref<1x8x1xf32, #tpu.memory_space<vmem>>, %arg11: memref<1x8x1xf32, #tpu.memory_space<vmem>>) attributes {dimension_semantics = [#tpu.dimension_semantics<arbitrary>, #tpu.dimension_semantics<arbitrary>], iteration_bounds = array<i64: 1, 1>, scalar_prefetch = 0 : i64, scratch_operands = 3 : i64, tpu.core_type = #tpu.core_type<tc>, window_params = [{transform_indices = @transform_0, window_bounds = array<i64: 8, 1>}, {transform_indices = @transform_1, window_bounds = array<i64: 8, 128>}, {transform_indices = @transform_2, window_bounds = array<i64: 128, 256>}, {transform_indices = @transform_3, window_bounds = array<i64: 1, 256>}, {transform_indices = @transform_4, window_bounds = array<i64: 8, 256>}, {transform_indices = @transform_5, window_bounds = array<i64: 8, 256>}, {transform_indices = @transform_6, window_bounds = array<i64: 8, 1>}]} {
    %c0_i32 = arith.constant 0 : i32
    %0 = arith.cmpi eq, %arg0, %c0_i32 : i32
    %1 = arith.extui %0 : i1 to i32
    %c0_i32_0 = arith.constant 0 : i32
    %2 = arith.cmpi ne, %1, %c0_i32_0 : i32
    scf.if %2 {
      %cst_44 = arith.constant 0xFF800000 : f32
      %102 = vector.broadcast %cst_44 : f32 to vector<8x1xf32>
      %103 = arith.index_cast %arg1 : i32 to index
      %c0_45 = arith.constant 0 : index
      %c0_46 = arith.constant 0 : index
      %104 = vector.load %arg9[%103, %c0_45, %c0_46] : memref<1x8x1xf32, #tpu.memory_space<vmem>>, vector<1x8x1xf32>
      %105 = vector.shape_cast %104 : vector<1x8x1xf32> to vector<8x1xf32>
      %106 = vector.shape_cast %102 : vector<8x1xf32> to vector<1x8x1xf32>
      tpu.vector_store %arg9[%103, %c0_45, %c0_46], %106 {strides = array<i32>} : memref<1x8x1xf32, #tpu.memory_space<vmem>>, vector<1x8x1xf32>,
      %cst_47 = arith.constant 0.000000e+00 : f32
      %107 = vector.broadcast %cst_47 : f32 to vector<8x1xf32>
      %108 = arith.index_cast %arg1 : i32 to index
      %c0_48 = arith.constant 0 : index
      %c0_49 = arith.constant 0 : index
      %109 = vector.load %arg10[%108, %c0_48, %c0_49] : memref<1x8x1xf32, #tpu.memory_space<vmem>>, vector<1x8x1xf32>
      %110 = vector.shape_cast %109 : vector<1x8x1xf32> to vector<8x1xf32>
      %111 = vector.shape_cast %107 : vector<8x1xf32> to vector<1x8x1xf32>
      tpu.vector_store %arg10[%108, %c0_48, %c0_49], %111 {strides = array<i32>} : memref<1x8x1xf32, #tpu.memory_space<vmem>>, vector<1x8x1xf32>,
      %cst_50 = arith.constant 0.000000e+00 : f32
      %112 = vector.broadcast %cst_50 : f32 to vector<8x1xf32>
      %113 = arith.index_cast %arg1 : i32 to index
      %c0_51 = arith.constant 0 : index
      %c0_52 = arith.constant 0 : index
      %114 = vector.load %arg11[%113, %c0_51, %c0_52] : memref<1x8x1xf32, #tpu.memory_space<vmem>>, vector<1x8x1xf32>
      %115 = vector.shape_cast %114 : vector<1x8x1xf32> to vector<8x1xf32>
      %116 = vector.shape_cast %112 : vector<8x1xf32> to vector<1x8x1xf32>
      tpu.vector_store %arg11[%113, %c0_51, %c0_52], %116 {strides = array<i32>} : memref<1x8x1xf32, #tpu.memory_space<vmem>>, vector<1x8x1xf32>,
    } else {
    }
    %c0 = arith.constant 0 : index
    %c0_1 = arith.constant 0 : index
    %3 = vector.load %arg3[%c0, %c0_1] : memref<8x128xf32, #tpu.memory_space<vmem>>, vector<8x128xf32>
    %4 = arith.mulf %3, %3 : vector<8x128xf32>
    %cst = arith.constant dense<0.000000e+00> : vector<8xf32>
    %5 = vector.multi_reduction <add>, %4, %cst [1] : vector<8x128xf32> to vector<8xf32>
    %6 = vector.shape_cast %5 : vector<8xf32> to vector<8x1xf32>
    %cst_2 = arith.constant 1.000000e-24 : f32
    %7 = vector.broadcast %cst_2 : f32 to vector<8x1xf32>
    %8 = arith.maximumf %6, %7 : vector<8x1xf32>
    %9 = math.rsqrt %8 : vector<8x1xf32>
    %10 = vector.broadcast %9 : vector<8x1xf32> to vector<8x128xf32>
    %11 = arith.mulf %3, %10 : vector<8x128xf32>
    %c0_3 = arith.constant 0 : index
    %c0_4 = arith.constant 0 : index
    %12 = vector.load %arg4[%c0_3, %c0_4] : memref<128x256xf32, #tpu.memory_space<vmem>>, vector<128x256xf32>
    %cst_5 = arith.constant dense<0.000000e+00> : vector<8x256xf32>
    %13 = tpu.matmul %11, %12, %cst_5 {dimension_numbers = #tpu.dot_dimension_numbers<[1], [0], [0], [1], [0, 0, 1, 1], [], []>} : vector<8x128xf32>, vector<128x256xf32>, vector<8x256xf32> -> vector<8x256xf32>
    %c0_6 = arith.constant 0 : index
    %c0_7 = arith.constant 0 : index
    %14 = vector.load %arg5[%c0_6, %c0_7] : memref<1x256xf32, #tpu.memory_space<vmem>>, vector<1x256xf32>
    %15 = vector.broadcast %14 : vector<1x256xf32> to vector<8x256xf32>
    %16 = arith.mulf %13, %15 : vector<8x256xf32>
    %c0_8 = arith.constant 0 : index
    %c0_9 = arith.constant 0 : index
    %17 = vector.load %arg6[%c0_8, %c0_9] : memref<8x256xf32, #tpu.memory_space<vmem>>, vector<8x256xf32>
    tpu.vector_store %arg6[%c0_8, %c0_9], %16 {strides = array<i32>} : memref<8x256xf32, #tpu.memory_space<vmem>>, vector<8x256xf32>,
    %cst_10 = arith.constant -1.000000e+00 : f32
    %cst_11 = arith.constant 1.000000e+00 : f32
    %18 = vector.broadcast %cst_10 : f32 to vector<8x256xf32>
    %19 = arith.maximumf %18, %16 : vector<8x256xf32>
    %20 = vector.broadcast %cst_11 : f32 to vector<8x256xf32>
    %21 = arith.minimumf %20, %19 : vector<8x256xf32>
    %c0_12 = arith.constant 0 : index
    %c0_13 = arith.constant 0 : index
    %22 = vector.load %arg2[%c0_12, %c0_13] : memref<8x1xi32, #tpu.memory_space<vmem>>, vector<8x1xi32>
    %23 = tpu.iota {dimensions = array<i32: 1>} : vector<8x256xi32>
    %c256_i32 = arith.constant 256 : i32
    %24 = arith.muli %arg0, %c256_i32 : i32
    %25 = vector.broadcast %24 : i32 to vector<8x256xi32>
    %26 = arith.addi %23, %25 : vector<8x256xi32>
    %27 = vector.broadcast %22 : vector<8x1xi32> to vector<8x256xi32>
    %28 = arith.cmpi eq, %26, %27 : vector<8x256xi32>
    %c256_i32_14 = arith.constant 256 : i32
    %29 = arith.muli %arg0, %c256_i32_14 : i32
    %30 = vector.broadcast %29 : i32 to vector<8x1xi32>
    %31 = arith.cmpi sge, %22, %30 : vector<8x1xi32>
    %c1_i32 = arith.constant 1 : i32
    %32 = arith.addi %arg0, %c1_i32 : i32
    %c256_i32_15 = arith.constant 256 : i32
    %33 = arith.muli %32, %c256_i32_15 : i32
    %34 = vector.broadcast %33 : i32 to vector<8x1xi32>
    %35 = arith.cmpi slt, %22, %34 : vector<8x1xi32>
    %36 = arith.andi %31, %35 : vector<8x1xi1>
    %cst_16 = arith.constant 0.000000e+00 : f32
    %37 = vector.broadcast %cst_16 : f32 to vector<8x256xf32>
    %38 = arith.select %28, %21, %37 : vector<8x256xi1>, vector<8x256xf32>
    %cst_17 = arith.constant dense<0.000000e+00> : vector<8xf32>
    %39 = vector.multi_reduction <add>, %38, %cst_17 [1] : vector<8x256xf32> to vector<8xf32>
    %40 = vector.shape_cast %39 : vector<8xf32> to vector<8x1xf32>
    %41 = arith.mulf %40, %40 : vector<8x1xf32>
    %cst_18 = arith.constant 1.000000e+00 : f32
    %42 = vector.broadcast %cst_18 : f32 to vector<8x1xf32>
    %43 = arith.subf %42, %41 : vector<8x1xf32>
    %cst_19 = arith.constant 0.000000e+00 : f32
    %cst_20 = arith.constant 1.000000e+00 : f32
    %44 = vector.broadcast %cst_19 : f32 to vector<8x1xf32>
    %45 = arith.maximumf %44, %43 : vector<8x1xf32>
    %46 = vector.broadcast %cst_20 : f32 to vector<8x1xf32>
    %47 = arith.minimumf %46, %45 : vector<8x1xf32>
    %48 = math.sqrt %47 : vector<8x1xf32>
    %cst_21 = arith.constant 0.87758255 : f32
    %49 = vector.broadcast %cst_21 : f32 to vector<8x1xf32>
    %50 = arith.mulf %40, %49 : vector<8x1xf32>
    %cst_22 = arith.constant 0.47942555 : f32
    %51 = vector.broadcast %cst_22 : f32 to vector<8x1xf32>
    %52 = arith.mulf %48, %51 : vector<8x1xf32>
    %53 = arith.subf %50, %52 : vector<8x1xf32>
    %54 = vector.shape_cast %53 : vector<8x1xf32> to vector<8x1xf32>
    %55 = vector.broadcast %54 : vector<8x1xf32> to vector<8x256xf32>
    %56 = arith.select %28, %55, %21 : vector<8x256xi1>, vector<8x256xf32>
    %cst_23 = arith.constant 6.400000e+01 : f32
    %57 = vector.broadcast %cst_23 : f32 to vector<8x256xf32>
    %58 = arith.mulf %56, %57 : vector<8x256xf32>
    %c0_24 = arith.constant 0 : index
    %c0_25 = arith.constant 0 : index
    %59 = vector.load %arg7[%c0_24, %c0_25] : memref<8x256xf32, #tpu.memory_space<vmem>>, vector<8x256xf32>
    tpu.vector_store %arg7[%c0_24, %c0_25], %58 {strides = array<i32>} : memref<8x256xf32, #tpu.memory_space<vmem>>, vector<8x256xf32>,
    %60 = arith.index_cast %arg1 : i32 to index
    %c0_26 = arith.constant 0 : index
    %c0_27 = arith.constant 0 : index
    %61 = vector.load %arg9[%60, %c0_26, %c0_27] : memref<1x8x1xf32, #tpu.memory_space<vmem>>, vector<1x8x1xf32>
    %62 = vector.shape_cast %61 : vector<1x8x1xf32> to vector<8x1xf32>
    %cst_28 = arith.constant dense<0xFF800000> : vector<8xf32>
    %63 = vector.multi_reduction <maximumf>, %58, %cst_28 [1] : vector<8x256xf32> to vector<8xf32>
    %64 = vector.shape_cast %63 : vector<8xf32> to vector<8x1xf32>
    %65 = arith.maximumf %62, %64 : vector<8x1xf32>
    %66 = arith.subf %62, %65 : vector<8x1xf32>
    %67 = math.exp %66 : vector<8x1xf32>
    %68 = arith.index_cast %arg1 : i32 to index
    %c0_29 = arith.constant 0 : index
    %c0_30 = arith.constant 0 : index
    %69 = vector.load %arg10[%68, %c0_29, %c0_30] : memref<1x8x1xf32, #tpu.memory_space<vmem>>, vector<1x8x1xf32>
    %70 = vector.shape_cast %69 : vector<1x8x1xf32> to vector<8x1xf32>
    %71 = arith.mulf %67, %70 : vector<8x1xf32>
    %72 = vector.broadcast %65 : vector<8x1xf32> to vector<8x256xf32>
    %73 = arith.subf %58, %72 : vector<8x256xf32>
    %74 = math.exp %73 : vector<8x256xf32>
    %cst_31 = arith.constant dense<0.000000e+00> : vector<8xf32>
    %75 = vector.multi_reduction <add>, %74, %cst_31 [1] : vector<8x256xf32> to vector<8xf32>
    %76 = vector.shape_cast %75 : vector<8xf32> to vector<8x1xf32>
    %77 = arith.addf %71, %76 : vector<8x1xf32>
    %78 = arith.index_cast %arg1 : i32 to index
    %c0_32 = arith.constant 0 : index
    %c0_33 = arith.constant 0 : index
    %79 = vector.load %arg11[%78, %c0_32, %c0_33] : memref<1x8x1xf32, #tpu.memory_space<vmem>>, vector<1x8x1xf32>
    %80 = vector.shape_cast %79 : vector<1x8x1xf32> to vector<8x1xf32>
    %cst_34 = arith.constant 6.400000e+01 : f32
    %81 = vector.broadcast %cst_34 : f32 to vector<8x1xf32>
    %82 = arith.mulf %53, %81 : vector<8x1xf32>
    %cst_35 = arith.constant 0.000000e+00 : f32
    %83 = vector.broadcast %cst_35 : f32 to vector<8x1xf32>
    %84 = arith.select %36, %82, %83 : vector<8x1xi1>, vector<8x1xf32>
    %85 = arith.addf %80, %84 : vector<8x1xf32>
    %86 = arith.index_cast %arg1 : i32 to index
    %c0_36 = arith.constant 0 : index
    %c0_37 = arith.constant 0 : index
    %87 = vector.load %arg9[%86, %c0_36, %c0_37] : memref<1x8x1xf32, #tpu.memory_space<vmem>>, vector<1x8x1xf32>
    %88 = vector.shape_cast %87 : vector<1x8x1xf32> to vector<8x1xf32>
    %89 = vector.shape_cast %65 : vector<8x1xf32> to vector<1x8x1xf32>
    tpu.vector_store %arg9[%86, %c0_36, %c0_37], %89 {strides = array<i32>} : memref<1x8x1xf32, #tpu.memory_space<vmem>>, vector<1x8x1xf32>,
    %90 = arith.index_cast %arg1 : i32 to index
    %c0_38 = arith.constant 0 : index
    %c0_39 = arith.constant 0 : index
    %91 = vector.load %arg10[%90, %c0_38, %c0_39] : memref<1x8x1xf32, #tpu.memory_space<vmem>>, vector<1x8x1xf32>
    %92 = vector.shape_cast %91 : vector<1x8x1xf32> to vector<8x1xf32>
    %93 = vector.shape_cast %77 : vector<8x1xf32> to vector<1x8x1xf32>
    tpu.vector_store %arg10[%90, %c0_38, %c0_39], %93 {strides = array<i32>} : memref<1x8x1xf32, #tpu.memory_space<vmem>>, vector<1x8x1xf32>,
    %94 = arith.index_cast %arg1 : i32 to index
    %c0_40 = arith.constant 0 : index
    %c0_41 = arith.constant 0 : index
    %95 = vector.load %arg11[%94, %c0_40, %c0_41] : memref<1x8x1xf32, #tpu.memory_space<vmem>>, vector<1x8x1xf32>
    %96 = vector.shape_cast %95 : vector<1x8x1xf32> to vector<8x1xf32>
    %97 = vector.shape_cast %85 : vector<8x1xf32> to vector<1x8x1xf32>
    tpu.vector_store %arg11[%94, %c0_40, %c0_41], %97 {strides = array<i32>} : memref<1x8x1xf32, #tpu.memory_space<vmem>>, vector<1x8x1xf32>,
    %98 = math.log %77 : vector<8x1xf32>
    %99 = arith.addf %65, %98 : vector<8x1xf32>
    %100 = arith.subf %99, %85 : vector<8x1xf32>
    %c0_42 = arith.constant 0 : index
    %c0_43 = arith.constant 0 : index
    %101 = vector.load %arg8[%c0_42, %c0_43] : memref<8x1xf32, #tpu.memory_space<vmem>>, vector<8x1xf32>
    tpu.vector_store %arg8[%c0_42, %c0_43], %100 {strides = array<i32>} : memref<8x1xf32, #tpu.memory_space<vmem>>, vector<8x1xf32>,
    return
  }
  func.func @transform_0(%arg0: i32, %arg1: i32) -> (i32, i32) {
    %c0_i32 = arith.constant 0 : i32
    %c0_i32_0 = arith.constant 0 : i32
    return %arg1, %c0_i32 : i32, i32
  }
  func.func @transform_1(%arg0: i32, %arg1: i32) -> (i32, i32) {
    %c0_i32 = arith.constant 0 : i32
    %c0_i32_0 = arith.constant 0 : i32
    return %arg1, %c0_i32 : i32, i32
  }
  func.func @transform_2(%arg0: i32, %arg1: i32) -> (i32, i32) {
    %c0_i32 = arith.constant 0 : i32
    %c0_i32_0 = arith.constant 0 : i32
    return %c0_i32, %arg0 : i32, i32
  }
  func.func @transform_3(%arg0: i32, %arg1: i32) -> (i32, i32) {
    %c0_i32 = arith.constant 0 : i32
    %c0_i32_0 = arith.constant 0 : i32
    return %c0_i32, %arg0 : i32, i32
  }
  func.func @transform_4(%arg0: i32, %arg1: i32) -> (i32, i32) {
    %c0_i32 = arith.constant 0 : i32
    return %arg1, %arg0 : i32, i32
  }
  func.func @transform_5(%arg0: i32, %arg1: i32) -> (i32, i32) {
    %c0_i32 = arith.constant 0 : i32
    return %arg1, %arg0 : i32, i32
  }
  func.func @transform_6(%arg0: i32, %arg1: i32) -> (i32, i32) {
    %c0_i32 = arith.constant 0 : i32
    %c0_i32_0 = arith.constant 0 : i32
    return %arg1, %c0_i32 : i32, i32
  }
}

</mosaic_0001>

<bundles_post_ra>
// kernel: tpu_custom_call.1
= control target key start
LH: loop header
LB: loop body
LE: loop exit
PB: predicated region body
PF: predicated region fallthrough
CT: control target
= control target key end

     0   :  { %12 = vsyncpa [#allocation6], 0  ;;  %s536_s0 = inlined_call_operand.vmem [shape: s32[8,1], index: 0, kind: input, shape index: {}]   ;;  %s537_s1 = inlined_call_operand.vmem [shape: f32[8,128], index: 1, kind: input, shape index: {}]   ;;  %s538_s2 = inlined_call_operand.hbm [shape: f32[128,256], index: 2, kind: input, shape index: {}]   ;;  %s539_s3 = inlined_call_operand.vmem [shape: f32[1,256], index: 3, kind: input, shape index: {}]   ;;  %s540_s4 = inlined_call_operand.hbm [shape: f32[8,256], index: 4, kind: output, shape index: {0}]   ;;  %s541_s5 = inlined_call_operand.hbm [shape: f32[8,256], index: 5, kind: output, shape index: {1}]   ;;  %s542_s6 = inlined_call_operand.vmem [shape: f32[8,1], index: 6, kind: output, shape index: {2}]  }
   0x1   :  { %13 = vsyncpa [#allocation7], 0 }
   0x2   :  { %14 = vsyncpa [#allocation10], 0  ;;  %s425_s21 = smov [#allocation5]   ;;  %s353_s25 = scalar_lea.hbm %s538_s2, 4096 }
   0x3   :  { %s24_s22 = sshll.u32 %s425_s21, 4  ;;  %p354_p0 = scmp.ne.s32.totalorder %s538_s2, %s353_s25  ;;  %s25_s22 = int_to_ptr.vmem [resolvable:$true] %s24_s22 }
   0x4   :  { %p357_p1 = scmp.lt.u32.totalorder %s353_s25, %s538_s2 }
   0x6   :  { %p359_p2 = pnand %p357_p1, %p354_p0 }
   0x8   :  { %362 = shalt.err (!%p359_p2)
}
   0x9   :  { %s363_s30 = scalar_lea.vmem %s25_s22, 4096  ;;  %p368_p4 = scmp.lt.s32.totalorder %s25_s22, %s25_s22 }
   0xa   :  { %p364_p3 = scmp.ne.s32.totalorder %s25_s22, %s363_s30  ;;  %p369_p5 = scmp.lt.s32.totalorder %s363_s30, %s363_s30 }
   0xc   :  { %p370_p6 = por %p369_p5, %p368_p4 }
   0xe   :  { %p371_p7 = pnand %p370_p6, %p364_p3 }
  0x10   :  { %374 = shalt.err (!%p371_p7)
}
  0x11   :  { %s426_s7 = smov 256   ;;  %s427_s8 = smov 16  }
  0x12   :  { %30 = dma.hbm_to_vmem [thread:$0]  %s538_s2, 4096, %s25_s22, [#allocation6], %s426_s7, %s426_s7, %s427_s8  }
  0x13   :  { %419 = dma.done.wait [#allocation6], 4096  }
  0x14   :  { %420 = vsyncadd [#allocation6], 4294963200  ;;  %v483_v0 = vld [vmem:[%s537_s1] sm:$0xff]  ;;  %v58_v2 = vld [vmem:[#allocation5 + $0x18] sm:$0xff]  ;;  %vm42_vm0 = vcmask 7168   ;;  %v428_v40 = vmov 0.0   ;;  %v160_v57 = vlaneseq }
  0x15   :  { %v56_v1 = vld [vmem:[#allocation5 + $0x8] sm:$0xff]  ;;  %v49_v3 = vmul.f32 %v483_v0, %v483_v0  ;;  %v55_v5 = vld [vmem:[#allocation5] sm:$0xff]  ;;  %v57_v6 = vld [vmem:[#allocation5 + $0x10] sm:$0xff]  ;;  %45 = vst.msk [vmem:[#allocation3] sm:$0xff] %vm42_vm0, %v428_v40  ;;  %151 = vmatprep.mubr.f32.mxu0 %v428_v40  ;;  %v429_v52 = vmov 0   ;;  %s432_s15 = smov [#allocation9]  }
  0x16   :  { %v299_v4 = vpack.c.bf16 %v58_v2, %v56_v1  ;;  %v60_v7 = vld [vmem:[#allocation5 + $0x28] sm:$0xff]  ;;  %v301_v8 = vpack.c.bf16 %v57_v6, %v55_v5  ;;  %v62_v9 = vld [vmem:[#allocation5 + $0x38] sm:$0xff]  ;;  %v59_v10 = vld [vmem:[#allocation5 + $0x20] sm:$0xff]  ;;  %47 = vst.msk [vmem:[#allocation4] sm:$0xff] %vm42_vm0, %v428_v40  ;;  %339 = vset.pattern.permute.xlu0 %v429_v52  ;;  %340 = vset.pattern.permute.xlu1 %v429_v52  ;;  %v161_v58 = vshrl.u32 %v160_v57, 7  ;;  %v180_v62 = vand.u32 127, %v160_v57 }
  0x17   :  { %v61_v11 = vld [vmem:[#allocation5 + $0x30] sm:$0xff]  ;;  %50 = vadd.xlane.f32.xlu0 %v49_v3  ;;  %v303_v12 = vpack.c.bf16 %v62_v9, %v60_v7  ;;  %v64_v13 = vld [vmem:[#allocation5 + $0x48] sm:$0xff]  ;;  %v66_v14 = vld [vmem:[#allocation5 + $0x58] sm:$0xff]  ;;  %s280_s16 = sshll.u32 %s432_s15, 4  ;;  %s281_s16 = int_to_ptr.vmem [resolvable:$true] %s280_s16 }
  0x18   :  { %300 = vmatprep.subr.bf16.mxu0 %v299_v4  ;;  %v305_v15 = vpack.c.bf16 %v61_v11, %v59_v10  ;;  %v307_v16 = vpack.c.bf16 %v66_v14, %v64_v13  ;;  %v63_v17 = vld [vmem:[#allocation5 + $0x40] sm:$0xff]  ;;  %v65_v18 = vld [vmem:[#allocation5 + $0x50] sm:$0xff]  ;;  %v68_v19 = vld [vmem:[#allocation5 + $0x68] sm:$0xff]  ;;  %v162_v59 = vsub.s32 0, %v161_v58  ;;  %v166_v61 = vsub.s32 1, %v161_v58 }
  0x19   :  { %302 = vmatpush1.bf16.msra.mxu0 %v301_v8  ;;  %v70_v20 = vld [vmem:[#allocation5 + $0x78] sm:$0xff]  ;;  %v309_v21 = vpack.c.bf16 %v65_v18, %v63_v17  ;;  %v67_v23 = vld [vmem:[#allocation5 + $0x60] sm:$0xff]  ;;  %v69_v24 = vld [vmem:[#allocation5 + $0x70] sm:$0xff]  ;;  %v181_v2 = vadd.s32 128, %v180_v62 }
  0x1a   :  { %304 = vmatprep.subr.bf16.mxu0 %v303_v12  ;;  %v311_v22 = vpack.c.bf16 %v70_v20, %v68_v19  ;;  %v72_v25 = vld [vmem:[#allocation5 + $0x88] sm:$0xff]  ;;  %v74_v26 = vld [vmem:[#allocation5 + $0x98] sm:$0xff]  ;;  %v313_v27 = vpack.c.bf16 %v69_v24, %v67_v23  ;;  %v71_v29 = vld [vmem:[#allocation5 + $0x80] sm:$0xff]  ;;  %v430_v12 = vmov -inf  }
  0x1b   :  { %v315_v28 = vpack.c.bf16 %v74_v26, %v72_v25  ;;  %v73_v30 = vld [vmem:[#allocation5 + $0x90] sm:$0xff]  ;;  %v76_v32 = vld [vmem:[#allocation5 + $0xa8] sm:$0xff]  ;;  %v78_v33 = vld [vmem:[#allocation5 + $0xb8] sm:$0xff]  ;;  %43 = vst.msk [vmem:[#allocation2] sm:$0xff] %vm42_vm0, %v430_v12 }
  0x1c   :  { %v317_v31 = vpack.c.bf16 %v73_v30, %v71_v29  ;;  %v319_v34 = vpack.c.bf16 %v78_v33, %v76_v32  ;;  %v75_v35 = vld [vmem:[#allocation5 + $0xa0] sm:$0xff]  ;;  %v77_v36 = vld [vmem:[#allocation5 + $0xb0] sm:$0xff]  ;;  %v80_v37 = vld [vmem:[#allocation5 + $0xc8] sm:$0xff] }
  0x1d   :  { %306 = vmatpush1.bf16.msra.mxu0 %v305_v15  ;;  %v82_v38 = vld [vmem:[#allocation5 + $0xd8] sm:$0xff]  ;;  %v321_v39 = vpack.c.bf16 %v77_v36, %v75_v35  ;;  %v79_v42 = vld [vmem:[#allocation5 + $0xc0] sm:$0xff]  ;;  %v81_v43 = vld [vmem:[#allocation5 + $0xd0] sm:$0xff] }
  0x1e   :  { %308 = vmatprep.subr.bf16.mxu0 %v307_v16  ;;  %v323_v41 = vpack.c.bf16 %v82_v38, %v80_v37  ;;  %v84_v44 = vld [vmem:[#allocation5 + $0xe8] sm:$0xff]  ;;  %v86_v45 = vld [vmem:[#allocation5 + $0xf8] sm:$0xff]  ;;  %v325_v46 = vpack.c.bf16 %v81_v43, %v79_v42  ;;  %v83_v48 = vld [vmem:[#allocation5 + $0xe0] sm:$0xff] }
  0x1f   :  { %v327_v47 = vpack.c.bf16 %v86_v45, %v84_v44  ;;  %v85_v49 = vld [vmem:[#allocation5 + $0xf0] sm:$0xff]  ;;  %v178_v51 = vld [vmem:[%s536_s0] sm:$0xff]  ;;  %v251_v29 = vld [vmem:[#allocation4] sm:$0xff]  ;;  %s431_s0 = smov [#allocation8]  }
  0x20   :  { %v329_v50 = vpack.c.bf16 %v85_v49, %v83_v48  ;;  %v158_v60 = vld [vmem:[%s539_s3] sm:$0x3]  ;;  %vm191_vm5 = vcmp.ge.s32.totalorder %v178_v51, 0  ;;  %vm195_vm6 = vcmp.lt.s32.totalorder %v178_v51, 256  ;;  %s270_s3 = sshll.u32 %s431_s0, 4  ;;  %s271_s3 = int_to_ptr.vmem [resolvable:$true] %s270_s3 }
  0x21   :  { %310 = vmatpush1.bf16.msra.mxu0 %v309_v21  ;;  %v163_v63 = vrot.slane %v158_v60, %v162_v59  ;;  %v167_v1 = vrot.slane %v158_v60, %v166_v61  ;;  %vm196_vm7 = vmand %vm191_vm5, %vm195_vm6  ;;  %s375_s17 = scalar_lea.vmem %s271_s3, 256  ;;  %p380_p9 = scmp.lt.s32.totalorder %s271_s3, %s271_s3 }
  0x22   :  { %312 = vmatprep.subr.bf16.mxu0 %v311_v22  ;;  %v224_v35 = vld [vmem:[#allocation2] sm:$0xff]  ;;  %p376_p8 = scmp.ne.s32.totalorder %s271_s3, %s375_s17  ;;  %p381_p10 = scmp.lt.s32.totalorder %s375_s17, %s375_s17 }
  0x24   :  { %p382_p11 = por %p381_p10, %p380_p9 }
  0x25   :  { %314 = vmatpush1.bf16.msra.mxu0 %v313_v27 }
  0x26   :  { %316 = vmatprep.subr.bf16.mxu0 %v315_v28  ;;  %p383_p12 = pnand %p382_p11, %p376_p8 }
  0x29   :  { %318 = vmatpush1.bf16.msra.mxu0 %v317_v31 }
  0x2a   :  { %320 = vmatprep.subr.bf16.mxu0 %v319_v34 }
  0x2d   :  { %322 = vmatpush1.bf16.msra.mxu0 %v321_v39  ;;  %187 = vperm.xlu0 %339, %v178_v51  }
  0x2e   :  { %324 = vmatprep.subr.bf16.mxu0 %v323_v41 }
  0x31   :  { %326 = vmatpush1.bf16.msra.mxu0 %v325_v46 }
  0x32   :  { %328 = vmatprep.subr.bf16.mxu0 %v327_v47 }
  0x35   :  { %330 = vmatpush1.bf16.msra.mxu0 %v329_v50 }
  0xa4   :  { %v51_v53 = vpop.xlane.xlu0 %50 }
  0xa5   :  { %v52_v54 = vmax.f32 %v51_v53, 1e-24 }
  0xa7   :  { %341 = vrsqrt.f32 %v52_v54 }
  0xac   :  { %v188_v3 = vpop.permute.xlu0 %187 }
  0xad   :  { %vm189_vm1 = vcmp.eq.s32.totalorder %v180_v62, %v188_v3  ;;  %vm190_vm2 = vcmp.eq.s32.totalorder %v181_v2, %v188_v3 }
  0xb1   :  { %v342_v55 = vpop.eup %341 }
  0xb2   :  { %v54_v56 = vmul.f32 %v342_v55, %v483_v0 }
  0xb4   :  { %152 = vmatmul.mubr.f32.vlgmr.msra.gmra.mrb[0].mxu0 %v54_v56 }
 0x187   :  { %v153_v4 = vpop.f32.mrb[0].mxu0 }
 0x188   :  { %v170_v5 = vmul.f32 %v163_v63, %v153_v4  ;;  %v155_v6 = vpop.f32.mrb[1].mxu0 }
 0x189   :  { %v171_v7 = vmul.f32 %v167_v1, %v155_v6 }
 0x18a   :  { %172 = vst [vmem:[#allocation8] sm:$0xff] %v170_v5  ;;  %v297_v0 = vclamps-f32 %v170_v5, 1.0 }
 0x18b   :  { %173 = vst [vmem:[#allocation8 + $0x8] sm:$0xff] %v171_v7  ;;  %v298_v8 = vclamps-f32 %v171_v7, 1.0 }
 0x18c   :  { %v197_v9 = vsel %vm189_vm1, %v297_v0, 0.0 }
 0x18d   :  { %v198_v10 = vsel %vm190_vm2, %v298_v8, 0.0 }
 0x18e   :  { %v199_v11 = vadd.f32 %v198_v10, %v197_v9 }
 0x190   :  { %200 = vadd.xlane.f32.xlu1 %v199_v11 }
 0x21d   :  { %v201_v13 = vpop.xlane.xlu1 %200 }
 0x21e   :  { %v202_v14 = vmul.f32 %v201_v13, %v201_v13  ;;  %v213_v23 = vmul.f32 0.87758255, %v201_v13 }
 0x220   :  { %v203_v15 = vsub.f32 1.0, %v202_v14 }
 0x222   :  { %v204_v16 = vmax.f32 %v203_v15, 0.0 }
 0x224   :  { %v205_v17 = vmin.f32 %v204_v16, 1.0 }
 0x226   :  { %343 = vrsqrt.f32 %v205_v17  ;;  %vm208_vm3 = vcmp.eq.f32.partialorder %v205_v17, inf  ;;  %v211_v20 = vand.u32 2147483648, %v205_v17  ;;  %vm210_vm4 = vcmp.eq.f32.partialorder %v205_v17, 0.0 }
 0x230   :  { %v344_v18 = vpop.eup %343 }
 0x231   :  { %v207_v19 = vmul.f32 %v344_v18, %v205_v17 }
 0x233   :  { %v209_v21 = vsel %vm208_vm3, %v205_v17, %v207_v19 }
 0x234   :  { %v212_v22 = vsel %vm210_vm4, %v211_v20, %v209_v21 }
 0x235   :  { %v214_v24 = vmul.f32 0.47942555, %v212_v22 }
 0x237   :  { %v215_v25 = vsub.f32 %v213_v23, %v214_v24 }
 0x239   :  { %v252_v26 = vmul.f32 64.0, %v215_v25  ;;  %v216_v27 = vsel %vm189_vm1, %v215_v25, %v297_v0  ;;  %v217_v28 = vsel %vm190_vm2, %v215_v25, %v298_v8 }
 0x23a   :  { %v218_v30 = vmul.f32 64.0, %v216_v27  ;;  %v219_v31 = vmul.f32 64.0, %v217_v28 }
 0x23b   :  { %v253_v32 = vsel %vm196_vm7, %v252_v26, 0.0 }
 0x23c   :  { %v225_v33 = vmax.f32 %v218_v30, %v219_v31  ;;  %220 = vst [vmem:[#allocation9] sm:$0xff] %v218_v30  ;;  %221 = vst [vmem:[#allocation9 + $0x8] sm:$0xff] %v219_v31  ;;  %v501_v34 = vadd.f32 %v253_v32, %v251_v29 }
 0x23e   :  { %226 = vmax.xlane.f32.xlu1 %v225_v33  ;;  %258 = vst.msk [vmem:[#allocation4] sm:$0xff] %vm42_vm0, %v501_v34 }
 0x2cb   :  { %v227_v36 = vpop.xlane.xlu1 %226 }
 0x2cc   :  { %v228_v37 = vmax.f32 %v224_v35, %v227_v36 }
 0x2ce   :  { %256 = vst.msk [vmem:[#allocation2] sm:$0xff] %vm42_vm0, %v228_v37  ;;  %237 = vperm.xlu1 %340, %v228_v37  }
 0x34d   :  { %v238_v38 = vpop.permute.xlu1 %237 }
 0x34e   :  { %v240_v39 = vsub.f32 %v218_v30, %v238_v38  ;;  %v241_v40 = vsub.f32 %v219_v31, %v238_v38 }
 0x350   :  { %v242_v41 = vmul.f32 1.442695, %v240_v39  ;;  %v244_v42 = vmul.f32 1.442695, %v241_v40 }
 0x352   :  { %345 = vpow2.f32 %v242_v41 }
 0x353   :  { %347 = vpow2.f32 %v244_v42 }
 0x35c   :  { %v346_v43 = vpop.eup %345 }
 0x35d   :  { %v348_v44 = vpop.eup %347 }
 0x35e   :  { %v246_v45 = vadd.f32 %v348_v44, %v346_v43 }
 0x360   :  { %247 = vadd.xlane.f32.xlu1 %v246_v45 }
 0x361   :  { %386 = shalt.err (!%p383_p12)
}
 0x362   :  { %s387_s20 = scalar_lea.hbm %s540_s4, 256 }
 0x363   :  { %p388_p13 = scmp.ne.s32.totalorder %s540_s4, %s387_s20  ;;  %p391_p0 = scmp.lt.u32.totalorder %s387_s20, %s540_s4 }
 0x365   :  { %p393_p1 = pnand %p391_p0, %p388_p13 }
 0x367   :  { %396 = shalt.err (!%p393_p1)
}
 0x368   :  { %273 = dma.vmem_to_hbm [thread:$0]  %s271_s3, 256, %s540_s4, [#allocation7]  }
 0x369   :  { %s397_s27 = scalar_lea.vmem %s281_s16, 256  ;;  %p402_p3 = scmp.lt.s32.totalorder %s281_s16, %s281_s16 }
 0x36a   :  { %p398_p2 = scmp.ne.s32.totalorder %s281_s16, %s397_s27  ;;  %p403_p4 = scmp.lt.s32.totalorder %s397_s27, %s397_s27 }
 0x36c   :  { %p404_p5 = por %p403_p4, %p402_p3 }
 0x36e   :  { %p405_p6 = pnand %p404_p5, %p398_p2 }
 0x370   :  { %408 = shalt.err (!%p405_p6)
}
 0x371   :  { %s409_s30 = scalar_lea.hbm %s541_s5, 256 }
 0x372   :  { %p410_p7 = scmp.ne.s32.totalorder %s541_s5, %s409_s30  ;;  %p413_p8 = scmp.lt.u32.totalorder %s409_s30, %s541_s5 }
 0x374   :  { %p415_p9 = pnand %p413_p8, %p410_p7 }
 0x376   :  { %418 = shalt.err (!%p415_p9)
}
 0x377   :  { %283 = dma.vmem_to_hbm [thread:$0]  %s281_s16, 256, %s541_s5, [#allocation10]   ;;  %v229_v46 = vsub.f32 %v224_v35, %v228_v37  ;;  %v233_v49 = vld [vmem:[#allocation3] sm:$0xff] }
 0x379   :  { %v230_v47 = vmul.f32 1.442695, %v229_v46 }
 0x37b   :  { %349 = vpow2.f32 %v230_v47 }
 0x385   :  { %v350_v48 = vpop.eup %349 }
 0x386   :  { %v234_v50 = vmul.f32 %v350_v48, %v233_v49 }
 0x3ed   :  { %v248_v51 = vpop.xlane.xlu1 %247 }
 0x3ee   :  { %v249_v52 = vadd.f32 %v248_v51, %v234_v50 }
 0x3f0   :  { %257 = vst.msk [vmem:[#allocation3] sm:$0xff] %vm42_vm0, %v249_v52  ;;  %351 = vlog2.f32 %v249_v52 }
 0x3fa   :  { %v352_v53 = vpop.eup %351 }
 0x3fb   :  { %v260_v54 = vmul.f32 0.6931472, %v352_v53 }
 0x3fd   :  { %v261_v55 = vadd.f32 %v260_v54, %v228_v37 }
 0x3ff   :  { %v262_v56 = vsub.f32 %v261_v55, %v501_v34 }
 0x401   :  { %263 = vst.msk [vmem:[%s542_s6] sm:$0xff] %vm42_vm0, %v262_v56 }
 0x402   :  { %421 = dma.done.wait [#allocation7], 256  }
 0x403   :  { %422 = vsyncadd [#allocation7], 4294967040 }
 0x404   :  { %423 = dma.done.wait [#allocation10], 256  }
 0x405   :  { %424 = vsyncadd [#allocation10], 4294967040 }
 0x406   :  { %294 = vsyncpa [#allocation6], 1 }
 0x407   :  { %295 = vsyncpa [#allocation7], 1 }
 0x408   :  { %296 = vsyncpa [#allocation10], 1 }

</bundles_post_ra>
